<compile_context>
chip_gen: v6e
topology: v6e:2x2x1
jax: 0.10.0
libtpu: 0.0.40
codegen_flags: <defaults>
</compile_context>

<pallas_src>
import math
import functools

import numpy as np
import jax
import jax.numpy as jnp
from jax.experimental import pallas as pl
from jax.experimental.pallas import tpu as pltpu

_BN_EPS = 1e-5
_VMEM_LIMIT = 32 * 1024 * 1024


# ----------------------------------------------------------------------------
# host-side helpers
# ----------------------------------------------------------------------------
def _interp_coeffs(n_in, n_out):
    """align_corners=True source indices / fractions (UpsamplingBilinear2d)."""
    if n_in == 1:
        i0 = np.zeros((n_out,), np.int32)
        return i0, i0.copy(), np.zeros((n_out,), np.float32)
    scale = (n_in - 1) / (n_out - 1)
    src = np.arange(n_out, dtype=np.float64) * scale
    i0 = np.clip(np.floor(src).astype(np.int64), 0, n_in - 1)
    i1 = np.minimum(i0 + 1, n_in - 1)
    f = (src - i0).astype(np.float32)
    return i0.astype(np.int32), i1.astype(np.int32), f


def _upsample_matrix(n_in, n_out):
    """(n_out, n_in) separable interpolation matrix, align_corners=True."""
    i0, i1, f = _interp_coeffs(n_in, n_out)
    A = np.zeros((n_out, n_in), np.float32)
    A[np.arange(n_out), i0] += 1.0 - f
    A[np.arange(n_out), i1] += f
    return A


# ----------------------------------------------------------------------------
# in-kernel helper: im2col of a zero-padded VMEM buffer
# ----------------------------------------------------------------------------
def _im2col(src_ref, ho, wo):
    """src_ref: (ho+2, wo+2, C) zero-padded VMEM ref -> (ho*wo, 9*C) patches."""
    c = src_ref.shape[-1]
    cols = []
    for ky in range(3):
        for kx in range(3):
            cols.append(src_ref[ky:ky + ho, kx:kx + wo, :].reshape(ho * wo, c))
    return jnp.concatenate(cols, axis=-1)


# ----------------------------------------------------------------------------
# Kernel 1: standalone 3x3 conv + folded BN + ReLU  (used for conv_more)
# ----------------------------------------------------------------------------
def _conv_bn_relu_kernel(x_ref, w_ref, s_ref, b_ref, out_ref, xpad_ref):
    H, W, Cin = x_ref.shape
    Cout = w_ref.shape[-1]
    # zero-halo pad entirely in VMEM
    xpad_ref[...] = jnp.zeros_like(xpad_ref)
    xpad_ref[1:H + 1, 1:W + 1, :] = x_ref[...]
    # im2col -> one deep-K MXU matmul
    p = _im2col(xpad_ref, H, W)                                 # (H*W, 9*Cin)
    y = jnp.dot(p, w_ref[...], preferred_element_type=jnp.float32)
    y = jnp.maximum(y * s_ref[...] + b_ref[...], 0.0)           # (H*W, Cout)
    out_ref[...] = y.reshape(H, W * Cout).astype(out_ref.dtype)  # lane-dense store


def conv3x3_bn_relu(x, w, scale, bias):
    """x: (N, H, W, Cin) f32 -> (N, H, W, Cout). w: (9*Cin, Cout) im2col layout."""
    N, H, W, Cin = x.shape
    Cout = w.shape[-1]
    out = pl.pallas_call(
        _conv_bn_relu_kernel,
        out_shape=jax.ShapeDtypeStruct((N, H, W * Cout), jnp.float32),
        grid=(N,),
        in_specs=[
            pl.BlockSpec((None, H, W, Cin), lambda n: (n, 0, 0, 0)),
            pl.BlockSpec((9 * Cin, Cout), lambda n: (0, 0)),
            pl.BlockSpec((1, Cout), lambda n: (0, 0)),
            pl.BlockSpec((1, Cout), lambda n: (0, 0)),
        ],
        out_specs=pl.BlockSpec((None, H, W * Cout), lambda n: (n, 0, 0)),
        scratch_shapes=[pltpu.VMEM((H + 2, W + 2, Cin), jnp.float32)],
        compiler_params=pltpu.CompilerParams(
            dimension_semantics=("parallel",),
            vmem_limit_bytes=_VMEM_LIMIT),
    )(x, w, scale.reshape(1, Cout).astype(jnp.float32),
      bias.reshape(1, Cout).astype(jnp.float32))
    return out.reshape(N, H, W, Cout)


# ----------------------------------------------------------------------------
# Kernel 2: fused decoder block
#   upsample2x (align_corners) -> concat skip -> conv1+BN+ReLU -> conv2+BN+ReLU
# ----------------------------------------------------------------------------
def _decoder_block_kernel(*refs, has_skip):
    if has_skip:
        (x_ref, ah_ref, aw_ref, skip_ref,
         w1_ref, s1_ref, b1_ref, w2_ref, s2_ref, b2_ref,
         out_ref, rowup_ref, xpad_ref, y1pad_ref) = refs
    else:
        (x_ref, ah_ref, aw_ref,
         w1_ref, s1_ref, b1_ref, w2_ref, s2_ref, b2_ref,
         out_ref, rowup_ref, xpad_ref, y1pad_ref) = refs
        skip_ref = None

    H, W, Cx = x_ref.shape
    Ho, Wo = 2 * H, 2 * W
    C1 = w1_ref.shape[-1]
    C2 = w2_ref.shape[-1]

    # ---- bilinear 2x upsample (align_corners=True) via separable matmuls ----
    aw = aw_ref[...]                                            # (Wo, W)
    for i in range(H):                                          # unrolled, H <= 32
        rowup_ref[i] = jnp.dot(aw, x_ref[i],
                               preferred_element_type=jnp.float32)   # (Wo, Cx)
    up = jnp.dot(ah_ref[...], rowup_ref[...].reshape(H, Wo * Cx),
                 preferred_element_type=jnp.float32)            # (Ho, Wo*Cx)
    up = up.reshape(Ho, Wo, Cx)

    # ---- zero-halo pad + channel-concat of the skip, fully in VMEM ----
    if has_skip:
        up = jnp.concatenate([up, skip_ref[...]], axis=-1)      # (Ho, Wo, Cx+Csk)
    xpad_ref[...] = jnp.zeros_like(xpad_ref)
    xpad_ref[1:Ho + 1, 1:Wo + 1, :] = up

    # ---- conv1: im2col -> single deep-K MXU matmul -> folded BN -> ReLU ----
    p1 = _im2col(xpad_ref, Ho, Wo)                              # (Ho*Wo, 9*Cin1)
    y1 = jnp.dot(p1, w1_ref[...], preferred_element_type=jnp.float32)
    y1 = jnp.maximum(y1 * s1_ref[...] + b1_ref[...], 0.0)       # (Ho*Wo, C1)

    # ---- conv2 (reads conv1 result straight from VMEM scratch) ----
    y1pad_ref[...] = jnp.zeros_like(y1pad_ref)
    y1pad_ref[1:Ho + 1, 1:Wo + 1, :] = y1.reshape(Ho, Wo, C1)
    p2 = _im2col(y1pad_ref, Ho, Wo)                             # (Ho*Wo, 9*C1)
    y2 = jnp.dot(p2, w2_ref[...], preferred_element_type=jnp.float32)
    y2 = jnp.maximum(y2 * s2_ref[...] + b2_ref[...], 0.0)       # (Ho*Wo, C2)

    # lane-dense store: minor dim Wo*C2 (e.g. 1024 for the last block)
    out_ref[...] = y2.reshape(Ho, Wo * C2).astype(out_ref.dtype)


def fused_decoder_block(x, skip, w1, s1, b1, w2, s2, b2):
    """x: (N, H, W, Cx); skip: (N, 2H, 2W, Csk) or None -> (N, 2H, 2W, C2)."""
    N, H, W, Cx = x.shape
    Ho, Wo = 2 * H, 2 * W
    has_skip = skip is not None
    Csk = skip.shape[-1] if has_skip else 0
    Cin1 = Cx + Csk
    C1 = w1.shape[-1]
    C2 = w2.shape[-1]
    if has_skip:
        assert skip.shape[:3] == (N, Ho, Wo), skip.shape
    assert w1.shape[0] == 9 * Cin1 and w2.shape[0] == 9 * C1

    ah = jnp.asarray(_upsample_matrix(H, Ho))
    aw = jnp.asarray(_upsample_matrix(W, Wo))

    in_specs = [
        pl.BlockSpec((None, H, W, Cx), lambda n: (n, 0, 0, 0)),
        pl.BlockSpec((Ho, H), lambda n: (0, 0)),
        pl.BlockSpec((Wo, W), lambda n: (0, 0)),
    ]
    args = [x, ah, aw]
    if has_skip:
        in_specs.append(pl.BlockSpec((None, Ho, Wo, Csk), lambda n: (n, 0, 0, 0)))
        args.append(skip)
    in_specs += [
        pl.BlockSpec((9 * Cin1, C1), lambda n: (0, 0)),
        pl.BlockSpec((1, C1), lambda n: (0, 0)),
        pl.BlockSpec((1, C1), lambda n: (0, 0)),
        pl.BlockSpec((9 * C1, C2), lambda n: (0, 0)),
        pl.BlockSpec((1, C2), lambda n: (0, 0)),
        pl.BlockSpec((1, C2), lambda n: (0, 0)),
    ]
    args += [w1,
             s1.reshape(1, C1).astype(jnp.float32),
             b1.reshape(1, C1).astype(jnp.float32),
             w2,
             s2.reshape(1, C2).astype(jnp.float32),
             b2.reshape(1, C2).astype(jnp.float32)]

    out = pl.pallas_call(
        functools.partial(_decoder_block_kernel, has_skip=has_skip),
        out_shape=jax.ShapeDtypeStruct((N, Ho, Wo * C2), jnp.float32),
        grid=(N,),
        in_specs=in_specs,
        out_specs=pl.BlockSpec((None, Ho, Wo * C2), lambda n: (n, 0, 0)),
        scratch_shapes=[
            pltpu.VMEM((H, Wo, Cx), jnp.float32),             # W-upsampled rows
            pltpu.VMEM((Ho + 2, Wo + 2, Cin1), jnp.float32),  # padded conv1 input
            pltpu.VMEM((Ho + 2, Wo + 2, C1), jnp.float32),    # padded conv1 output
        ],
        compiler_params=pltpu.CompilerParams(
            dimension_semantics=("parallel",),
            vmem_limit_bytes=_VMEM_LIMIT),
    )(*args)
    return out.reshape(N, Ho, Wo, C2)


# ----------------------------------------------------------------------------
# Parameter construction (mirrors the PyTorch __init__ shapes, inference BN)
# ----------------------------------------------------------------------------
def _init_conv_bn(key, cin, cout):
    kw, kg, kb, km, kv = jax.random.split(key, 5)
    # Conv2d(cin, cout, 3, padding=1, bias=False) weight, OIHW
    w = jax.random.normal(kw, (cout, cin, 3, 3), jnp.float32) / math.sqrt(cin * 9)
    gamma = 1.0 + 0.1 * jax.random.normal(kg, (cout,), jnp.float32)
    beta = 0.1 * jax.random.normal(kb, (cout,), jnp.float32)
    running_mean = 0.1 * jax.random.normal(km, (cout,), jnp.float32)
    running_var = 1.0 + 0.1 * jnp.abs(jax.random.normal(kv, (cout,), jnp.float32))
    scale = gamma / jnp.sqrt(running_var + _BN_EPS)
    bias = beta - running_mean * scale
    # im2col weight layout: row index = (ky*3 + kx)*Cin + ci, col = Cout
    w_mat = jnp.transpose(w, (2, 3, 1, 0)).reshape(9 * cin, cout)
    return dict(w=w_mat, scale=scale, bias=bias)


class Config:
    def __init__(self):
        self.hidden_size = 32
        self.decoder_channels = (64, 32, 16, 16)
        self.n_skip = 3
        self.skip_channels = [32, 16, 8, 16]


def build_decoder_cup_params(key, config):
    head_channels = 512
    decoder_channels = list(config.decoder_channels)
    in_channels = [head_channels] + decoder_channels[:-1]
    out_channels = decoder_channels
    if config.n_skip != 0:
        skip_channels = list(config.skip_channels)
        for i in range(4 - config.n_skip):
            skip_channels[3 - i] = 0
    else:
        skip_channels = [0, 0, 0, 0]

    keys = jax.random.split(key, 1 + 2 * len(decoder_channels))
    params = dict(
        conv_more=_init_conv_bn(keys[0], config.hidden_size, head_channels),
        blocks=[])
    for i, (ic, oc, sc) in enumerate(zip(in_channels, out_channels, skip_channels)):
        params['blocks'].append(dict(
            conv1=_init_conv_bn(keys[1 + 2 * i], ic + sc, oc),
            conv2=_init_conv_bn(keys[2 + 2 * i], oc, oc)))
    return params, skip_channels


# ----------------------------------------------------------------------------
# DecoderCup forward (Pallas)
# ----------------------------------------------------------------------------
def decoder_cup_forward(params, config, hidden_states, features=None):
    """hidden_states: NCHW (B, hidden_size, H, W); features[i]: NCHW or None."""
    x = jnp.transpose(hidden_states, (0, 2, 3, 1)).astype(jnp.float32)  # NHWC
    p = params['conv_more']
    x = conv3x3_bn_relu(x, p['w'], p['scale'], p['bias'])
    for i, bp in enumerate(params['blocks']):
        skip = None
        if features is not None and i < config.n_skip:
            f = features[i]
            if f is not None:
                skip = jnp.transpose(f, (0, 2, 3, 1)).astype(jnp.float32)
        x = fused_decoder_block(
            x, skip,
            bp['conv1']['w'], bp['conv1']['scale'], bp['conv1']['bias'],
            bp['conv2']['w'], bp['conv2']['scale'], bp['conv2']['bias'])
    return jnp.transpose(x, (0, 3, 1, 2))  # back to NCHW


# ----------------------------------------------------------------------------
# Pure-JAX reference (independent formulation) for correctness check
# ----------------------------------------------------------------------------
def _ref_conv_bn_relu(x, w_mat, scale, bias):
    cout = w_mat.shape[1]
    cin = w_mat.shape[0] // 9
    w_hwio = w_mat.reshape(3, 3, cin, cout)
    y = jax.lax.conv_general_dilated(
        x, w_hwio, window_strides=(1, 1), padding='SAME',
        dimension_numbers=('NHWC', 'HWIO', 'NHWC'),
        precision=jax.lax.Precision.HIGHEST)
    return jnp.maximum(y * scale + bias, 0.0)


def _ref_upsample2x(x):
    _, H, W, _ = x.shape
    ah = jnp.asarray(_upsample_matrix(H, 2 * H))
    aw = jnp.asarray(_upsample_matrix(W, 2 * W))
    y = jnp.einsum('oh,nhwc->nowc', ah, x, precision=jax.lax.Precision.HIGHEST)
    return jnp.einsum('pw,nowc->nopc', aw, y, precision=jax.lax.Precision.HIGHEST)


def ref_decoder_cup(params, config, hidden_states, features=None):
    x = jnp.transpose(hidden_states, (0, 2, 3, 1)).astype(jnp.float32)
    p = params['conv_more']
    x = _ref_conv_bn_relu(x, p['w'], p['scale'], p['bias'])
    for i, bp in enumerate(params['blocks']):
        x = _ref_upsample2x(x)
        skip = None
        if features is not None and i < config.n_skip:
            f = features[i]
            if f is not None:
                skip = jnp.transpose(f, (0, 2, 3, 1)).astype(jnp.float32)
        if skip is not None:
            x = jnp.concatenate([x, skip], axis=-1)
        x = _ref_conv_bn_relu(x, bp['conv1']['w'], bp['conv1']['scale'], bp['conv1']['bias'])
        x = _ref_conv_bn_relu(x, bp['conv2']['w'], bp['conv2']['scale'], bp['conv2']['bias'])
    return jnp.transpose(x, (0, 3, 1, 2))


# ----------------------------------------------------------------------------
if __name__ == "__main__":
    cfg = Config()
    key = jax.random.PRNGKey(0)
    kparam, kh, kf0, kf1, kf2 = jax.random.split(key, 5)

    params, skip_channels = build_decoder_cup_params(kparam, cfg)

    B, Hg, Wg = 2, 4, 4
    hidden_states = jax.random.normal(kh, (B, cfg.hidden_size, Hg, Wg), jnp.float32)
    features = [
        jax.random.normal(kf0, (B, skip_channels[0], 2 * Hg, 2 * Wg), jnp.float32),
        jax.random.normal(kf1, (B, skip_channels[1], 4 * Hg, 4 * Wg), jnp.float32),
        jax.random.normal(kf2, (B, skip_channels[2], 8 * Hg, 8 * Wg), jnp.float32),
        None,  # block 3 has no skip (skip_channels[3] == 0)
    ]

    out = decoder_cup_forward(params, cfg, hidden_states, features)
    out = jax.block_until_ready(out)

    assert out.shape == (B, cfg.decoder_channels[-1], 16 * Hg, 16 * Wg), out.shape
    assert bool(jnp.all(jnp.isfinite(out)))

    ref = jax.block_until_ready(ref_decoder_cup(params, cfg, hidden_states, features))
    rel_err = float(jnp.linalg.norm(out - ref) / (jnp.linalg.norm(ref) + 1e-8))
    assert rel_err < 2e-2, f"relative error too large: {rel_err}"

    print("KERNEL_OK")
</pallas_src>

<mosaic_0001>
module attributes {stable_mosaic.version = 11 : i64} {
  func.func @_conv_bn_relu_kernel(%arg0: i32, %arg1: memref<1x4x4x32xf32, #tpu.memory_space<vmem>>, %arg2: memref<288x512xf32, #tpu.memory_space<vmem>>, %arg3: memref<1x512xf32, #tpu.memory_space<vmem>>, %arg4: memref<1x512xf32, #tpu.memory_space<vmem>>, %arg5: memref<1x4x2048xf32, #tpu.memory_space<vmem>>, %arg6: memref<6x6x32xf32, #tpu.memory_space<vmem>>) attributes {dimension_semantics = [#tpu.dimension_semantics<parallel>], iteration_bounds = array<i64: 2>, scalar_prefetch = 0 : i64, scratch_operands = 1 : i64, tpu.core_type = #tpu.core_type<tc>, window_params = [{transform_indices = @transform_0, window_bounds = array<i64: 1, 4, 4, 32>}, {pipeline_mode = #tpu.pipeline_mode<synchronous>, transform_indices = @transform_1, window_bounds = array<i64: 288, 512>}, {pipeline_mode = #tpu.pipeline_mode<synchronous>, transform_indices = @transform_2, window_bounds = array<i64: 1, 512>}, {pipeline_mode = #tpu.pipeline_mode<synchronous>, transform_indices = @transform_3, window_bounds = array<i64: 1, 512>}, {transform_indices = @transform_4, window_bounds = array<i64: 1, 4, 2048>}]} {
    %cst = arith.constant 0.000000e+00 : f32
    %0 = vector.broadcast %cst : f32 to vector<6x6x32xf32>
    %c0 = arith.constant 0 : index
    %c0_0 = arith.constant 0 : index
    %c0_1 = arith.constant 0 : index
    %1 = vector.load %arg6[%c0, %c0_0, %c0_1] : memref<6x6x32xf32, #tpu.memory_space<vmem>>, vector<6x6x32xf32>
    tpu.vector_store %arg6[%c0, %c0_0, %c0_1], %0 {strides = array<i32>} : memref<6x6x32xf32, #tpu.memory_space<vmem>>, vector<6x6x32xf32>,
    %c0_2 = arith.constant 0 : index
    %c0_3 = arith.constant 0 : index
    %c0_4 = arith.constant 0 : index
    %c0_5 = arith.constant 0 : index
    %2 = vector.load %arg1[%c0_2, %c0_3, %c0_4, %c0_5] : memref<1x4x4x32xf32, #tpu.memory_space<vmem>>, vector<1x4x4x32xf32>
    %3 = vector.shape_cast %2 : vector<1x4x4x32xf32> to vector<4x4x32xf32>
    %c1 = arith.constant 1 : index
    %c1_6 = arith.constant 1 : index
    %c0_7 = arith.constant 0 : index
    %4 = vector.load %arg6[%c1, %c1_6, %c0_7] : memref<6x6x32xf32, #tpu.memory_space<vmem>>, vector<4x4x32xf32>
    tpu.vector_store %arg6[%c1, %c1_6, %c0_7], %3 {strides = array<i32>} : memref<6x6x32xf32, #tpu.memory_space<vmem>>, vector<4x4x32xf32>,
    %c0_8 = arith.constant 0 : index
    %c0_9 = arith.constant 0 : index
    %c0_10 = arith.constant 0 : index
    %5 = vector.load %arg6[%c0_8, %c0_9, %c0_10] : memref<6x6x32xf32, #tpu.memory_space<vmem>>, vector<4x4x32xf32>
    %6 = vector.shape_cast %5 : vector<4x4x32xf32> to vector<16x32xf32>
    %c0_11 = arith.constant 0 : index
    %c1_12 = arith.constant 1 : index
    %c0_13 = arith.constant 0 : index
    %7 = vector.load %arg6[%c0_11, %c1_12, %c0_13] : memref<6x6x32xf32, #tpu.memory_space<vmem>>, vector<4x4x32xf32>
    %8 = vector.shape_cast %7 : vector<4x4x32xf32> to vector<16x32xf32>
    %c0_14 = arith.constant 0 : index
    %c2 = arith.constant 2 : index
    %c0_15 = arith.constant 0 : index
    %9 = vector.load %arg6[%c0_14, %c2, %c0_15] : memref<6x6x32xf32, #tpu.memory_space<vmem>>, vector<4x4x32xf32>
    %10 = vector.shape_cast %9 : vector<4x4x32xf32> to vector<16x32xf32>
    %c1_16 = arith.constant 1 : index
    %c0_17 = arith.constant 0 : index
    %c0_18 = arith.constant 0 : index
    %11 = vector.load %arg6[%c1_16, %c0_17, %c0_18] : memref<6x6x32xf32, #tpu.memory_space<vmem>>, vector<4x4x32xf32>
    %12 = vector.shape_cast %11 : vector<4x4x32xf32> to vector<16x32xf32>
    %c1_19 = arith.constant 1 : index
    %c1_20 = arith.constant 1 : index
    %c0_21 = arith.constant 0 : index
    %13 = vector.load %arg6[%c1_19, %c1_20, %c0_21] : memref<6x6x32xf32, #tpu.memory_space<vmem>>, vector<4x4x32xf32>
    %14 = vector.shape_cast %13 : vector<4x4x32xf32> to vector<16x32xf32>
    %c1_22 = arith.constant 1 : index
    %c2_23 = arith.constant 2 : index
    %c0_24 = arith.constant 0 : index
    %15 = vector.load %arg6[%c1_22, %c2_23, %c0_24] : memref<6x6x32xf32, #tpu.memory_space<vmem>>, vector<4x4x32xf32>
    %16 = vector.shape_cast %15 : vector<4x4x32xf32> to vector<16x32xf32>
    %c2_25 = arith.constant 2 : index
    %c0_26 = arith.constant 0 : index
    %c0_27 = arith.constant 0 : index
    %17 = vector.load %arg6[%c2_25, %c0_26, %c0_27] : memref<6x6x32xf32, #tpu.memory_space<vmem>>, vector<4x4x32xf32>
    %18 = vector.shape_cast %17 : vector<4x4x32xf32> to vector<16x32xf32>
    %c2_28 = arith.constant 2 : index
    %c1_29 = arith.constant 1 : index
    %c0_30 = arith.constant 0 : index
    %19 = vector.load %arg6[%c2_28, %c1_29, %c0_30] : memref<6x6x32xf32, #tpu.memory_space<vmem>>, vector<4x4x32xf32>
    %20 = vector.shape_cast %19 : vector<4x4x32xf32> to vector<16x32xf32>
    %c2_31 = arith.constant 2 : index
    %c2_32 = arith.constant 2 : index
    %c0_33 = arith.constant 0 : index
    %21 = vector.load %arg6[%c2_31, %c2_32, %c0_33] : memref<6x6x32xf32, #tpu.memory_space<vmem>>, vector<4x4x32xf32>
    %22 = vector.shape_cast %21 : vector<4x4x32xf32> to vector<16x32xf32>
    %23 = tpu.concatenate %6, %8, %10, %12, %14, %16, %18, %20, %22 in 1 : vector<16x32xf32>, vector<16x32xf32>, vector<16x32xf32>, vector<16x32xf32>, vector<16x32xf32>, vector<16x32xf32>, vector<16x32xf32>, vector<16x32xf32>, vector<16x32xf32> -> vector<16x288xf32>
    %c0_34 = arith.constant 0 : index
    %c0_35 = arith.constant 0 : index
    %24 = vector.load %arg2[%c0_34, %c0_35] : memref<288x512xf32, #tpu.memory_space<vmem>>, vector<288x512xf32>
    %cst_36 = arith.constant dense<0.000000e+00> : vector<16x512xf32>
    %25 = tpu.matmul %23, %24, %cst_36 {dimension_numbers = #tpu.dot_dimension_numbers<[1], [0], [0], [1], [0, 0, 1, 1], [], []>} : vector<16x288xf32>, vector<288x512xf32>, vector<16x512xf32> -> vector<16x512xf32>
    %c0_37 = arith.constant 0 : index
    %c0_38 = arith.constant 0 : index
    %26 = vector.load %arg3[%c0_37, %c0_38] : memref<1x512xf32, #tpu.memory_space<vmem>>, vector<1x512xf32>
    %27 = vector.broadcast %26 : vector<1x512xf32> to vector<16x512xf32>
    %28 = arith.mulf %25, %27 : vector<16x512xf32>
    %c0_39 = arith.constant 0 : index
    %c0_40 = arith.constant 0 : index
    %29 = vector.load %arg4[%c0_39, %c0_40] : memref<1x512xf32, #tpu.memory_space<vmem>>, vector<1x512xf32>
    %30 = vector.broadcast %29 : vector<1x512xf32> to vector<16x512xf32>
    %31 = arith.addf %28, %30 : vector<16x512xf32>
    %cst_41 = arith.constant 0.000000e+00 : f32
    %32 = vector.broadcast %cst_41 : f32 to vector<16x512xf32>
    %33 = arith.maximumf %31, %32 : vector<16x512xf32>
    %34 = vector.shape_cast %33 : vector<16x512xf32> to vector<4x2048xf32>
    %c0_42 = arith.constant 0 : index
    %c0_43 = arith.constant 0 : index
    %c0_44 = arith.constant 0 : index
    %35 = vector.load %arg5[%c0_42, %c0_43, %c0_44] : memref<1x4x2048xf32, #tpu.memory_space<vmem>>, vector<1x4x2048xf32>
    %36 = vector.shape_cast %35 : vector<1x4x2048xf32> to vector<4x2048xf32>
    %37 = vector.shape_cast %34 : vector<4x2048xf32> to vector<1x4x2048xf32>
    tpu.vector_store %arg5[%c0_42, %c0_43, %c0_44], %37 {strides = array<i32>} : memref<1x4x2048xf32, #tpu.memory_space<vmem>>, vector<1x4x2048xf32>,
    return
  }
  func.func @transform_0(%arg0: i32) -> (i32, i32, i32, i32) {
    %c0_i32 = arith.constant 0 : i32
    %c0_i32_0 = arith.constant 0 : i32
    %c0_i32_1 = arith.constant 0 : i32
    %c0_i32_2 = arith.constant 0 : i32
    return %arg0, %c0_i32, %c0_i32_0, %c0_i32_1 : i32, i32, i32, i32
  }
  func.func @transform_1(%arg0: i32) -> (i32, i32) {
    %c0_i32 = arith.constant 0 : i32
    %c0_i32_0 = arith.constant 0 : i32
    %c0_i32_1 = arith.constant 0 : i32
    return %c0_i32, %c0_i32_0 : i32, i32
  }
  func.func @transform_2(%arg0: i32) -> (i32, i32) {
    %c0_i32 = arith.constant 0 : i32
    %c0_i32_0 = arith.constant 0 : i32
    %c0_i32_1 = arith.constant 0 : i32
    return %c0_i32, %c0_i32_0 : i32, i32
  }
  func.func @transform_3(%arg0: i32) -> (i32, i32) {
    %c0_i32 = arith.constant 0 : i32
    %c0_i32_0 = arith.constant 0 : i32
    %c0_i32_1 = arith.constant 0 : i32
    return %c0_i32, %c0_i32_0 : i32, i32
  }
  func.func @transform_4(%arg0: i32) -> (i32, i32, i32) {
    %c0_i32 = arith.constant 0 : i32
    %c0_i32_0 = arith.constant 0 : i32
    %c0_i32_1 = arith.constant 0 : i32
    return %arg0, %c0_i32, %c0_i32_0 : i32, i32, i32
  }
}

</mosaic_0001>

<bundles_post_ra>
// kernel: tpu_custom_call.1
= control target key start
LH: loop header
LB: loop body
LE: loop exit
PB: predicated region body
PF: predicated region fallthrough
CT: control target
= control target key end

     0   :  { %9 = vsyncpa [#allocation4], 0  ;;  %s1911_s0 = inlined_call_operand.hbm [shape: f32[2,4,4,32], index: 0, kind: input, shape index: {}]   ;;  %s1912_s1 = inlined_call_operand.hbm [shape: f32[288,512], index: 1, kind: input, shape index: {}]   ;;  %s1913_s2 = inlined_call_operand.hbm [shape: f32[1,512], index: 2, kind: input, shape index: {}]   ;;  %s1914_s3 = inlined_call_operand.vmem [shape: f32[1,512], index: 3, kind: input, shape index: {}]   ;;  %s1915_s4 = inlined_call_operand.hbm [shape: f32[2,4,2048], index: 4, kind: output, shape index: {}]  }
   0x1   :  { %11 = vsyncpa [#allocation4 + $0x1], 0 }
   0x2   :  { %12 = vsyncpa [#allocation7], 0 }
   0x3   :  { %13 = vsyncpa [#allocation5], 0 }
   0x4   :  { %15 = vsyncpa [#allocation5 + $0x1], 0  ;;  %s1678_s15 = smov 0   ;;  %s1680_s16 = smov 0  }
   0x5   :  { %s1682_s17 = smov 0   ;;  %s1684_s18 = smov 0  }
   0x6 LB: > { %s1699_s19 = sadd.s32 4294967295, %s1636_s18   ;;  %s1330_s20 = sadd.s32 4294967294, %s1636_s18   ;;  %s1636_s18 = sphi %s1684_s18, %s1937_s18   ;;  %s1632_s17 = sphi %s1682_s17, %s1936_s17   ;;  %s1628_s16 = sphi %s1680_s16, %s1935_s16   ;;  %s1624_s15 = sphi %s1678_s15, %s1934_s15  }
   0x7   : > { %p41_p0 = scmp.ne.s32.totalorder %s1628_s16, %s1624_s15  ;;  %p1916_p1 = scmp.eq.s32.totalorder %s1699_s19, 0 }
   0x8   : > { %p134_p3 = scmp.eq.s32.totalorder %s1330_s20, 1  ;;  %p1331_p5 = scmp.ge.s32.totalorder %s1636_s18, 1 }
   0x9   : > { %p1708_p4 = por %p1916_p1, %p41_p0  ;;  %p141_p7 = scmp.lt.s32.totalorder %s1636_s18, 3 }
   0xa   : > { %p1713_p6 = por %p134_p3, %p41_p0  ;;  %s1638_s24 = smov [#allocation6]  }
   0xb   : > { %s1920_s21 = scalar_select %p1708_p4, 1, 0 }
   0xc   : > { %s1921_s22 = scalar_select %p1713_p6, 1, 0 }
   0xd   : > { %p1718_p8 = pnand %p1331_p5, %p141_p7  ;;  %s153_s25 = sshll.u32 %s1638_s24, 4  ;;  %s154_s25 = int_to_ptr.vmem [resolvable:$true] %s153_s25 }
   0xe   : > { %s1639_s27 = smov [#allocation8]   ;;  %s1499_s29 = scalar_lea.vmem %s154_s25, 18432 }
   0xf   : > { %s1922_s23 = scalar_select %p1718_p8, 1, 0 }
  0x10   : > { %p1374_p9 = pneg %p1718_p8  ;;  %s167_s28 = sshll.u32 %s1639_s27, 4  ;;  %s168_s28 = int_to_ptr.vmem [resolvable:$true] %s167_s28 }
  0x11   : > { %p1500_p13 = scmp.ne.s32.totalorder %s154_s25, %s1499_s29  ;;  %p1507_p5 = scmp.lt.s32.totalorder %s154_s25, %s154_s25 }
  0x12   : > { %p1727_p11 = pnand %p1374_p9, %p1916_p1  ;;  %p1508_p7 = scmp.lt.s32.totalorder %s1499_s29, %s1499_s29 }
  0x14   : > { %p1490_p12 = pneg %p1727_p11  ;;  %p1509_p10 = por %p1508_p7, %p1507_p5 }
  0x16   : > { %p1502_p0 = pnand %p1500_p13, %p1490_p12 }
  0x18   : > { %p1503_p3 = pneg %p1502_p0 }
  0x1a   : > { %p1510_p9 = pnand %p1509_p10, %p1503_p3 }
  0x1c   : > { %1513 = shalt.err (!%p1510_p9)
}
  0x1d   : > { %s1640_s30 = smov 512   ;;  %s1641_s5 = smov 32  }
  0x1e   : > { %1377 = dma.hbm_to_vmem [thread:$0]  (!%p1727_p11), %s1912_s1, 18432, %s154_s25, [#allocation7], %s1640_s30, %s1640_s30, %s1641_s5  }
  0x1f   : > { %s1525_s8 = scalar_lea.vmem %s168_s28, 64  ;;  %p1533_p2 = scmp.lt.s32.totalorder %s168_s28, %s168_s28 }
  0x20   : > { %p1526_p1 = scmp.ne.s32.totalorder %s168_s28, %s1525_s8  ;;  %p1534_p6 = scmp.lt.s32.totalorder %s1525_s8, %s1525_s8 }
  0x22   : > { %p1528_p13 = pnand %p1526_p1, %p1490_p12  ;;  %p1535_p5 = por %p1534_p6, %p1533_p2 }
  0x24   : > { %p1529_p0 = pneg %p1528_p13 }
  0x26   : > { %p1536_p10 = pnand %p1535_p5, %p1529_p0 }
  0x28   : > { %1539 = shalt.err (!%p1536_p10)
}
  0x29   : > { %1380 = dma.hbm_to_vmem [thread:$0]  (!%p1727_p11), %s1913_s2, 64, %s168_s28, [#allocation7]  }
  0x2a   : > { %s1750_s11 = sadd.s32 1, %s1636_s18   ;;  %s28_s12 = sadd.s32 1, %s1632_s17 }
  0x2b   : > { %s25_s13 = ssub.s32 %s1636_s18, %s1750_s11  ;;  %p35_p1 = scmp.ne.s32.totalorder %s1632_s17, %s1628_s16 }
  0x2c   : > { %p26_p2 = scmp.eq.s32.totalorder %s25_s13, 0  ;;  %p36_p6 = scmp.eq.s32.totalorder %s1636_s18, 0 }
  0x2d   : > { %p1924_p12 = scmp.eq.s32.totalorder %s1699_s19, 1  ;;  %p1391_p7 = scmp.lt.s32.totalorder %s1636_s18, 2 }
  0x2e   : > { %s1766_s20 = scalar_select %p26_p2, %s1632_s17, %s28_s12  }
  0x2f   : > { %p1760_p3 = por %p1924_p12, %p35_p1  ;;  %p37_p9 = por %p36_p6, %p35_p1 }
  0x30   : > { %s181_s24 = sand.u32 1, %s1632_s17   ;;  %s1360_s26 = sshll.u32 %s1636_s18, 8 }
  0x31   : > { %s1925_s14 = scalar_select %p1760_p3, 1, 0 }
  0x32   : > { %s1335_s25 = sshll.u32 %s181_s24, 4  ;;  %s1773_s29 = scalar_lea.hbm %s1911_s0, %s1360_s26 }
  0x33   : > { %s185_s30 = scalar_lea.vmem [#allocation3], %s1335_s25  ;;  %p1777_p11 = pnand %p1391_p7, %p37_p9 }
  0x34   : > { %s192_s5 = sshll.u32 %s185_s30, 4  ;;  %s1781_s7 = scalar_lea.sflag [#allocation4], %s181_s24  ;;  %s1775_s5 = int_to_ptr.vmem [resolvable:$true] %s192_s5 }
  0x35   : > { %s1540_s8 = scalar_lea.hbm %s1773_s29, 256  ;;  %p1542_p0 = pneg %p1777_p11 }
  0x36   : > { %p1541_p13 = scmp.ne.s32.totalorder %s1773_s29, %s1540_s8  ;;  %s1545_s12 = scalar_lea.hbm %s1911_s0, 512 }
  0x37   : > { %p1546_p1 = scmp.lt.s32.totalorder %s1773_s29, %s1911_s0  ;;  %p1547_p2 = scmp.lt.s32.totalorder %s1545_s12, %s1540_s8 }
  0x38   : > { %p1543_p5 = pnand %p1542_p0, %p1541_p13 }
  0x39   : > { %p1548_p6 = por %p1547_p2, %p1546_p1 }
  0x3a   : > { %p1544_p10 = pneg %p1543_p5 }
  0x3c   : > { %p1549_p12 = pnand %p1548_p6, %p1544_p10 }
  0x3e   : > { %1552 = shalt.err (!%p1549_p12)
}
  0x3f   : > { %s1553_s24 = scalar_lea.vmem %s1775_s5, 256  ;;  %s1642_s26 = smov [#allocation3]  }
  0x40   : > { %p1554_p7 = scmp.ne.s32.totalorder %s1775_s5, %s1553_s24  ;;  %s1558_s27 = sshll.u32 %s1642_s26, 4  ;;  %s1559_s27 = int_to_ptr.vmem [resolvable:$false] %s1558_s27 }
  0x41   : > { %s1560_s28 = scalar_lea.vmem %s1559_s27, 512  ;;  %p1561_p5 = scmp.lt.s32.totalorder %s1775_s5, %s1559_s27 }
  0x42   : > { %p1556_p9 = pnand %p1554_p7, %p1542_p0  ;;  %p1562_p3 = scmp.lt.s32.totalorder %s1560_s28, %s1553_s24 }
  0x44   : > { %p1557_p13 = pneg %p1556_p9  ;;  %p1563_p4 = por %p1562_p3, %p1561_p5 }
  0x46   : > { %p1564_p8 = pnand %p1563_p4, %p1557_p13 }
  0x48   : > { %1567 = shalt.err (!%p1564_p8)
}
  0x49   : > { %s1643_s30 = smov 64   ;;  %s1644_s8 = smov 4  }
  0x4a   : > { %1384 = dma.hbm_to_vmem [thread:$0]  (!%p1777_p11), %s1773_s29, 256, %s1775_s5, %s1781_s7, %s1643_s30, %s1643_s30, %s1644_s8  }
  0x4b   : > { %p1927_p0 = scmp.ne.s32.totalorder %s1922_s23, 0 }
  0x4c   : > { %s1805_s9 = sand.u32 (!%p1927_p0), 1, %s1628_s16   ;;  %p1928_p4 = scmp.ne.s32.totalorder (!%p1927_p0), %s1920_s21, 0 }
  0x4d   : > { %204 = sbr.rel (%p1927_p0) target bundleno = 472 (0x1d8), region = 36  ;;  %s1339_s10 = sshll.u32 (!%p1927_p0), %s1805_s9, 4 }
  0x4e   : > { %s207_s12 = scalar_lea.sflag (!%p1927_p0), [#allocation4], %s1805_s9  ;;  %s210_s13 = scalar_lea.vmem (!%p1927_p0), [#allocation3], %s1339_s10 }
  0x52   : > { %1611 = dma.done.wait (%p1928_p4), %s207_s12, 256  }
  0x53   : > { %1613 = vsyncadd (%p1928_p4), %s207_s12, 4294967040  ;;  %p1929_p8 = scmp.eq.s32.totalorder %s1699_s19, 0 }
  0x55   : > { %1615 = dma.done.wait (%p1929_p8), [#allocation7], 18496   ;;  %p1930_p3 = pmov %p1929_p8 }
  0x56   : > { %vm243_vm0 = vcmask 259072   ;;  %v1645_v0 = vmov 0.0   ;;  %vm255_vm1 = vcmask 257024   ;;  %v250_v1 = vld [vmem:[%s210_s13] sm:$0xf]  ;;  %v547_v5 = vld [vmem:[#allocation6 + $0x468] sm:$0xff] }
  0x57   : > { %1617 = vsyncadd (%p1930_p3), [#allocation7], 4294948800  ;;  %244 = vst.msk [vmem:[#allocation2] sm:$0x3f] %vm243_vm0, %v1645_v0  ;;  %695 = vmatprep.mubr.f32.mxu1 %v1645_v0  ;;  %v251_v2 = vld [vmem:[%s210_s13 + $0x4] sm:$0xf]  ;;  %655 = vmatprep.subr.mxu1 %v547_v5 }
  0x58   : > { %245 = vst.msk [vmem:[#allocation2 + $0x8] sm:$0x3f] %vm243_vm0, %v1645_v0  ;;  %246 = vst.msk [vmem:[#allocation2 + $0x10] sm:$0x3f] %vm243_vm0, %v1645_v0  ;;  %v252_v3 = vld [vmem:[%s210_s13 + $0x8] sm:$0xf] }
  0x59   : > { %247 = vst.msk [vmem:[#allocation2 + $0x18] sm:$0x3f] %vm243_vm0, %v1645_v0  ;;  %248 = vst.msk [vmem:[#allocation2 + $0x20] sm:$0x3f] %vm243_vm0, %v1645_v0  ;;  %v253_v4 = vld [vmem:[%s210_s13 + $0xc] sm:$0xf] }
  0x5a   : > { %249 = vst.msk [vmem:[#allocation2 + $0x28] sm:$0x3f] %vm243_vm0, %v1645_v0  ;;  %v546_v6 = vld [vmem:[#allocation6 + $0x460] sm:$0xff]  ;;  %v543_v7 = vld [vmem:[#allocation6 + $0x448] sm:$0xff]  ;;  %v469_v16 = vld [vmem:[#allocation6 + $0x1f8] sm:$0xff]  ;;  %vm391_vm2 = vcmask 261120  }
  0x5b   : > { %256 = vst.msk [vmem:[#allocation2 + $0x9] sm:$0xf] %vm255_vm1, %v250_v1  ;;  %257 = vst.msk [vmem:[#allocation2 + $0x11] sm:$0xf] %vm255_vm1, %v251_v2  ;;  %v542_v8 = vld [vmem:[#allocation6 + $0x440] sm:$0xff]  ;;  %656 = vmatpush1.msra.mxu1 %v546_v6  ;;  %v539_v9 = vld [vmem:[#allocation6 + $0x428] sm:$0xff] }
  0x5c   : > { %258 = vst.msk [vmem:[#allocation2 + $0x19] sm:$0xf] %vm255_vm1, %v252_v3  ;;  %259 = vst.msk [vmem:[#allocation2 + $0x21] sm:$0xf] %vm255_vm1, %v253_v4  ;;  %657 = vmatprep.subr.mxu1 %v543_v7  ;;  %v538_v10 = vld [vmem:[#allocation6 + $0x420] sm:$0xff]  ;;  %v467_v11 = vld [vmem:[#allocation6 + $0x1e8] sm:$0xff] }
  0x5d   : > { %v466_v12 = vld [vmem:[#allocation6 + $0x1e0] sm:$0xff]  ;;  %658 = vmatpush1.msra.mxu1 %v542_v8  ;;  %v535_v13 = vld [vmem:[#allocation6 + $0x408] sm:$0xff]  ;;  %554 = vmatprep.subr.mxu0 %v467_v11  ;;  %s1646_s21 = smov 32   ;;  %s1647_s23 = smov 96   ;;  %v468_v37 = vld [vmem:[#allocation6 + $0x1f0] sm:$0xff]  ;;  %vm394_vm3 = vcmask 523264  }
  0x5e   : > { %v534_v14 = vld [vmem:[#allocation6 + $0x400] sm:$0xff]  ;;  %v463_v15 = vld [vmem:[#allocation6 + $0x1c8] sm:$0xff]  ;;  %659 = vmatprep.subr.mxu1 %v539_v9  ;;  %555 = vmatpush1.msra.mxu0 %v466_v12  ;;  %s1648_s29 = smov 64   ;;  %v465_v39 = vld [vmem:[#allocation6 + $0x1d8] sm:$0xff]  ;;  %vm397_vm4 = vcmask 785408   ;;  %s1342_s7 = sshll.u32 %s1805_s9, 6 }
  0x5f   : > { %v462_v17 = vld [vmem:[#allocation6 + $0x1c0] sm:$0xff]  ;;  %v459_v18 = vld [vmem:[#allocation6 + $0x1a8] sm:$0xff]  ;;  %660 = vmatpush1.msra.mxu1 %v538_v10  ;;  %556 = vmatprep.subr.mxu0 %v463_v15  ;;  %v464_v41 = vld [vmem:[#allocation6 + $0x1d0] sm:$0xff]  ;;  %s1361_s25 = sshll.u32 %s1699_s19, 10  ;;  %s242_s24 = scalar_lea.vmem [#allocation9], %s1342_s7 }
  0x60   : > { %661 = vmatprep.subr.mxu1 %v535_v13  ;;  %557 = vmatpush1.msra.mxu0 %v462_v17  ;;  %v458_v40 = vld [vmem:[#allocation6 + $0x1a0] sm:$0xff]  ;;  %v455_v42 = vld [vmem:[#allocation6 + $0x188] sm:$0xff]  ;;  %v461_v43 = vld [vmem:[#allocation6 + $0x1b8] sm:$0xff]  ;;  %s1241_s26 = sshll.u32 %s242_s24, 4  ;;  %s1868_s19 = scalar_lea.hbm %s1915_s4, %s1361_s25  ;;  %s1870_s26 = int_to_ptr.vmem [resolvable:$true] %s1241_s26 }
  0x61   : > { %662 = vmatpush1.msra.mxu1 %v534_v14  ;;  %558 = vmatprep.subr.mxu0 %v459_v18  ;;  %v454_v44 = vld [vmem:[#allocation6 + $0x180] sm:$0xff]  ;;  %v460_v45 = vld [vmem:[#allocation6 + $0x1b0] sm:$0xff]  ;;  %v451_v46 = vld [vmem:[#allocation6 + $0x168] sm:$0xff]  ;;  %s1227_s30 = scalar_lea.sflag [#allocation5], %s1805_s9  ;;  %s1568_s8 = scalar_lea.vmem %s1870_s26, 1024 }
  0x62   : > { %v1470_v19 = vld [vmem:[#allocation2 + $0x1] ss:$8 sps:$4 sm:$0xff]   ;;  %708 = vmatprep.subr.mxu1 %v469_v16  ;;  %559 = vmatpush1.msra.mxu0 %v458_v40  ;;  %v450_v48 = vld [vmem:[#allocation6 + $0x160] sm:$0xff]  ;;  %v447_v50 = vld [vmem:[#allocation6 + $0x148] sm:$0xff]  ;;  %p1569_p11 = scmp.ne.s32.totalorder %s1870_s26, %s1568_s8  ;;  %p1931_p10 = scmp.ne.s32.totalorder %s1925_s14, 0 }
  0x63   : > { %v1471_v20 = vld [vmem:[#allocation2 + $0xa] ss:$8 sps:$4 sm:$0xff]   ;;  %v1477_v29 = vld [vmem:[#allocation2 + $0x1a] ss:$8 sps:$4 sm:$0xff]   ;;  %560 = vmatprep.subr.mxu0 %v455_v42  ;;  %s1652_s10 = smov [#allocation9]  }
  0x64   : > { %v1440_v21 = vpack.i.bf16 %v1470_v19, %v1471_v20  ;;  %v1472_v22 = vld [vmem:[#allocation2 + $0x8] ss:$8 sps:$4 sm:$0xff]   ;;  %v1480_v34 = vld [vmem:[#allocation2 + $0x18] ss:$8 sps:$4 sm:$0xff]   ;;  %561 = vmatpush1.msra.mxu0 %v454_v44  ;;  %p1570_p1 = pnand %p1569_p11, %p1931_p10  ;;  %s1572_s12 = sshll.u32 %s1652_s10, 4  ;;  %s1573_s12 = int_to_ptr.vmem [resolvable:$false] %s1572_s12 }
  0x65   : > { %v1473_v23 = vld [vmem:[#allocation2 + $0x11] ss:$8 sps:$4 sm:$0xff]   ;;  %v1474_v24 = vld [vmem:[#allocation2 + $0x2] ss:$8 sps:$4 sm:$0xff]   ;;  %562 = vmatprep.subr.mxu0 %v451_v46  ;;  %s1574_s13 = scalar_lea.vmem %s1573_s12, 2048  ;;  %p1575_p6 = scmp.lt.s32.totalorder %s1870_s26, %s1573_s12 }
  0x66   : > { %1441 = vrot.lane.b32.xlu0 %v1440_v21, %s1646_s21  ;;  %v1450_v25 = vpack.i.bf16 %v1472_v22, %v1473_v23  ;;  %v1475_v26 = vld [vmem:[#allocation2 + $0x10] ss:$8 sps:$4 sm:$0xff]   ;;  %v1479_v31 = vld [vmem:[#allocation2 + $0x20] ss:$8 sps:$4 sm:$0xff]   ;;  %563 = vmatpush1.msra.mxu0 %v450_v48  ;;  %p1571_p2 = pneg %p1570_p1  ;;  %p1576_p12 = scmp.lt.s32.totalorder %s1574_s13, %s1568_s8 }
  0x67   : > { %v1476_v27 = vld [vmem:[#allocation2 + $0x11] ss:$8 sps:$4 sm:$0xff]   ;;  %v1445_v28 = vpack.i.bf16 %v1474_v24, %v1475_v26  ;;  %v1481_v35 = vld [vmem:[#allocation2 + $0x21] ss:$8 sps:$4 sm:$0xff]   ;;  %564 = vmatprep.subr.mxu0 %v447_v50 }
  0x68   : > { %1451 = vrot.lane.b32.xlu1 %v1450_v25, %s1647_s23  ;;  %v1478_v30 = vld [vmem:[#allocation2 + $0x12] ss:$8 sps:$4 sm:$0xff]   ;;  %v1455_v32 = vpack.i.bf16 %v1476_v27, %v1477_v29  ;;  %v1465_v38 = vpack.i.bf16 %v1480_v34, %v1481_v35  ;;  %v457_v47 = vld [vmem:[#allocation6 + $0x198] sm:$0xff]  ;;  %v456_v49 = vld [vmem:[#allocation6 + $0x190] sm:$0xff]  ;;  %p1577_p7 = por %p1576_p12, %p1575_p6 }
  0x69   : > { %v1460_v33 = vpack.i.bf16 %v1478_v30, %v1479_v31  ;;  %v1824_v36 = vld [vmem:[#allocation2 + $0x12] ss:$8 sps:$4 sm:$0xff]   ;;  %v453_v51 = vld [vmem:[#allocation6 + $0x178] sm:$0xff]  ;;  %v452_v53 = vld [vmem:[#allocation6 + $0x170] sm:$0xff] }
  0x6a   : > { %1446 = vrot.lane.b32.xlu0 %v1445_v28, %s1648_s29  ;;  %1343 = vmatmul.mubr.msk.f32.vlgmr.msra.gmra.mxu1 %vm391_vm2, %v1824_v36  ;;  %v446_v52 = vld [vmem:[#allocation6 + $0x140] sm:$0xff]  ;;  %v443_v54 = vld [vmem:[#allocation6 + $0x128] sm:$0xff]  ;;  %v449_v55 = vld [vmem:[#allocation6 + $0x158] sm:$0xff]  ;;  %p1578_p9 = pnand %p1577_p7, %p1571_p2 }
  0x6b   : > { %709 = vmatpush1.msra.mxu1 %v468_v37  ;;  %v442_v56 = vld [vmem:[#allocation6 + $0x120] sm:$0xff]  ;;  %565 = vmatpush1.msra.mxu0 %v446_v52  ;;  %v448_v57 = vld [vmem:[#allocation6 + $0x150] sm:$0xff]  ;;  %v439_v58 = vld [vmem:[#allocation6 + $0x108] sm:$0xff] }
  0x6c   : > { %1456 = vrot.lane.b32.xlu1 %v1455_v32, %s1646_s21  ;;  %710 = vmatprep.subr.mxu1 %v465_v39  ;;  %v445_v59 = vld [vmem:[#allocation6 + $0x138] sm:$0xff]  ;;  %v438_v60 = vld [vmem:[#allocation6 + $0x100] sm:$0xff]  ;;  %v444_v61 = vld [vmem:[#allocation6 + $0x130] sm:$0xff] }
  0x6d   : > { %711 = vmatpush1.msra.mxu1 %v464_v41  ;;  %566 = vmatprep.subr.mxu0 %v443_v54  ;;  %v435_v62 = vld [vmem:[#allocation6 + $0xe8] sm:$0xff]  ;;  %v441_v63 = vld [vmem:[#allocation6 + $0x118] sm:$0xff]  ;;  %v434_v1 = vld [vmem:[#allocation6 + $0xe0] sm:$0xff] }
  0x6e   : > { %1461 = vrot.lane.b32.xlu0 %v1460_v33, %s1648_s29  ;;  %712 = vmatprep.subr.mxu1 %v461_v43  ;;  %v440_v2 = vld [vmem:[#allocation6 + $0x110] sm:$0xff]  ;;  %v431_v3 = vld [vmem:[#allocation6 + $0xc8] sm:$0xff]  ;;  %v437_v4 = vld [vmem:[#allocation6 + $0xf8] sm:$0xff] }
  0x6f   : > { %713 = vmatpush1.msra.mxu1 %v460_v45  ;;  %567 = vmatpush1.msra.mxu0 %v442_v56  ;;  %v430_v5 = vld [vmem:[#allocation6 + $0xc0] sm:$0xff]  ;;  %v436_v6 = vld [vmem:[#allocation6 + $0xf0] sm:$0xff]  ;;  %v427_v7 = vld [vmem:[#allocation6 + $0xa8] sm:$0xff] }
  0x70   : > { %1466 = vrot.lane.b32.xlu1 %v1465_v38, %s1647_s23  ;;  %714 = vmatprep.subr.mxu1 %v457_v47  ;;  %v433_v8 = vld [vmem:[#allocation6 + $0xd8] sm:$0xff]  ;;  %v426_v9 = vld [vmem:[#allocation6 + $0xa0] sm:$0xff]  ;;  %v432_v10 = vld [vmem:[#allocation6 + $0xd0] sm:$0xff] }
  0x71   : > { %715 = vmatpush1.msra.mxu1 %v456_v49  ;;  %568 = vmatprep.subr.mxu0 %v439_v58  ;;  %v423_v11 = vld [vmem:[#allocation6 + $0x88] sm:$0xff]  ;;  %v429_v12 = vld [vmem:[#allocation6 + $0xb8] sm:$0xff]  ;;  %v422_v13 = vld [vmem:[#allocation6 + $0x80] sm:$0xff] }
  0x72   : > { %716 = vmatprep.subr.mxu1 %v453_v51  ;;  %569 = vmatpush1.msra.mxu0 %v438_v60  ;;  %v428_v14 = vld [vmem:[#allocation6 + $0xb0] sm:$0xff]  ;;  %v419_v15 = vld [vmem:[#allocation6 + $0x68] sm:$0xff]  ;;  %v425_v16 = vld [vmem:[#allocation6 + $0x98] sm:$0xff] }
  0x73   : > { %717 = vmatpush1.msra.mxu1 %v452_v53  ;;  %570 = vmatprep.subr.mxu0 %v435_v62  ;;  %v418_v17 = vld [vmem:[#allocation6 + $0x60] sm:$0xff]  ;;  %v424_v18 = vld [vmem:[#allocation6 + $0x90] sm:$0xff]  ;;  %v415_v19 = vld [vmem:[#allocation6 + $0x48] sm:$0xff] }
  0x74   : > { %718 = vmatprep.subr.mxu1 %v449_v55  ;;  %571 = vmatpush1.msra.mxu0 %v434_v1  ;;  %v421_v20 = vld [vmem:[#allocation6 + $0x78] sm:$0xff]  ;;  %v414_v21 = vld [vmem:[#allocation6 + $0x40] sm:$0xff]  ;;  %v420_v22 = vld [vmem:[#allocation6 + $0x70] sm:$0xff] }
  0x75   : > { %719 = vmatpush1.msra.mxu1 %v448_v57  ;;  %572 = vmatprep.subr.mxu0 %v431_v3  ;;  %v411_v23 = vld [vmem:[#allocation6 + $0x28] sm:$0xff]  ;;  %v417_v24 = vld [vmem:[#allocation6 + $0x58] sm:$0xff]  ;;  %v410_v25 = vld [vmem:[#allocation6 + $0x20] sm:$0xff] }
  0x76   : > { %720 = vmatprep.subr.mxu1 %v445_v59  ;;  %573 = vmatpush1.msra.mxu0 %v430_v5  ;;  %v416_v26 = vld [vmem:[#allocation6 + $0x50] sm:$0xff]  ;;  %v407_v27 = vld [vmem:[#allocation6 + $0x8] sm:$0xff]  ;;  %v413_v28 = vld [vmem:[#allocation6 + $0x38] sm:$0xff] }
  0x77   : > { %721 = vmatpush1.msra.mxu1 %v444_v61  ;;  %574 = vmatprep.subr.mxu0 %v427_v7  ;;  %v406_v29 = vld [vmem:[#allocation6] sm:$0xff]  ;;  %v412_v30 = vld [vmem:[#allocation6 + $0x30] sm:$0xff]  ;;  %v531_v31 = vld [vmem:[#allocation6 + $0x3e8] sm:$0xff] }
  0x78   : > { %722 = vmatprep.subr.mxu1 %v441_v63  ;;  %575 = vmatpush1.msra.mxu0 %v426_v9  ;;  %v409_v32 = vld [vmem:[#allocation6 + $0x18] sm:$0xff]  ;;  %v530_v33 = vld [vmem:[#allocation6 + $0x3e0] sm:$0xff]  ;;  %v408_v34 = vld [vmem:[#allocation6 + $0x10] sm:$0xff] }
  0x79   : > { %723 = vmatpush1.msra.mxu1 %v440_v2  ;;  %576 = vmatprep.subr.mxu0 %v423_v11  ;;  %v527_v35 = vld [vmem:[#allocation6 + $0x3c8] sm:$0xff]  ;;  %v533_v37 = vld [vmem:[#allocation6 + $0x3f8] sm:$0xff]  ;;  %v526_v38 = vld [vmem:[#allocation6 + $0x3c0] sm:$0xff] }
  0x7a   : > { %724 = vmatprep.subr.mxu1 %v437_v4  ;;  %577 = vmatpush1.msra.mxu0 %v422_v13  ;;  %v532_v39 = vld [vmem:[#allocation6 + $0x3f0] sm:$0xff]  ;;  %v523_v40 = vld [vmem:[#allocation6 + $0x3a8] sm:$0xff]  ;;  %v529_v41 = vld [vmem:[#allocation6 + $0x3d8] sm:$0xff] }
  0x7b   : > { %725 = vmatpush1.msra.mxu1 %v436_v6  ;;  %578 = vmatprep.subr.mxu0 %v419_v15  ;;  %v522_v42 = vld [vmem:[#allocation6 + $0x3a0] sm:$0xff]  ;;  %v528_v43 = vld [vmem:[#allocation6 + $0x3d0] sm:$0xff]  ;;  %v519_v44 = vld [vmem:[#allocation6 + $0x388] sm:$0xff] }
  0x7c   : > { %726 = vmatprep.subr.mxu1 %v433_v8  ;;  %579 = vmatpush1.msra.mxu0 %v418_v17  ;;  %v525_v45 = vld [vmem:[#allocation6 + $0x3b8] sm:$0xff]  ;;  %v518_v46 = vld [vmem:[#allocation6 + $0x380] sm:$0xff]  ;;  %v524_v47 = vld [vmem:[#allocation6 + $0x3b0] sm:$0xff] }
  0x7d   : > { %727 = vmatpush1.msra.mxu1 %v432_v10  ;;  %580 = vmatprep.subr.mxu0 %v415_v19  ;;  %v515_v48 = vld [vmem:[#allocation6 + $0x368] sm:$0xff]  ;;  %v521_v49 = vld [vmem:[#allocation6 + $0x398] sm:$0xff]  ;;  %v520_v50 = vld [vmem:[#allocation6 + $0x390] sm:$0xff] }
  0x7e   : > { %728 = vmatprep.subr.mxu1 %v429_v12  ;;  %581 = vmatpush1.msra.mxu0 %v414_v21  ;;  %v514_v51 = vld [vmem:[#allocation6 + $0x360] sm:$0xff]  ;;  %v517_v52 = vld [vmem:[#allocation6 + $0x378] sm:$0xff]  ;;  %v511_v53 = vld [vmem:[#allocation6 + $0x348] sm:$0xff] }
  0x7f   : > { %729 = vmatpush1.msra.mxu1 %v428_v14  ;;  %582 = vmatprep.subr.mxu0 %v411_v23  ;;  %v516_v54 = vld [vmem:[#allocation6 + $0x370] sm:$0xff]  ;;  %v510_v55 = vld [vmem:[#allocation6 + $0x340] sm:$0xff]  ;;  %v513_v56 = vld [vmem:[#allocation6 + $0x358] sm:$0xff] }
  0x80   : > { %730 = vmatprep.subr.mxu1 %v425_v16  ;;  %583 = vmatpush1.msra.mxu0 %v410_v25  ;;  %v507_v57 = vld [vmem:[#allocation6 + $0x328] sm:$0xff]  ;;  %v512_v58 = vld [vmem:[#allocation6 + $0x350] sm:$0xff]  ;;  %v506_v59 = vld [vmem:[#allocation6 + $0x320] sm:$0xff] }
  0x81   : > { %731 = vmatpush1.msra.mxu1 %v424_v18  ;;  %584 = vmatprep.subr.mxu0 %v407_v27  ;;  %v509_v60 = vld [vmem:[#allocation6 + $0x338] sm:$0xff]  ;;  %v503_v61 = vld [vmem:[#allocation6 + $0x308] sm:$0xff]  ;;  %v508_v62 = vld [vmem:[#allocation6 + $0x330] sm:$0xff] }
  0x82   : > { %732 = vmatprep.subr.mxu1 %v421_v20  ;;  %585 = vmatpush1.msra.mxu0 %v406_v29  ;;  %v502_v63 = vld [vmem:[#allocation6 + $0x300] sm:$0xff]  ;;  %v505_v1 = vld [vmem:[#allocation6 + $0x318] sm:$0xff]  ;;  %v499_v2 = vld [vmem:[#allocation6 + $0x2e8] sm:$0xff] }
  0x83   : > { %733 = vmatpush1.msra.mxu1 %v420_v22  ;;  %586 = vmatprep.subr.mxu0 %v531_v31  ;;  %v504_v3 = vld [vmem:[#allocation6 + $0x310] sm:$0xff]  ;;  %v498_v4 = vld [vmem:[#allocation6 + $0x2e0] sm:$0xff]  ;;  %v495_v5 = vld [vmem:[#allocation6 + $0x2c8] sm:$0xff] }
  0x84   : > { %734 = vmatprep.subr.mxu1 %v417_v24  ;;  %587 = vmatpush2.msra.mxu0 %v530_v33  ;;  %v501_v6 = vld [vmem:[#allocation6 + $0x2f8] sm:$0xff]  ;;  %v494_v7 = vld [vmem:[#allocation6 + $0x2c0] sm:$0xff]  ;;  %v500_v8 = vld [vmem:[#allocation6 + $0x2f0] sm:$0xff] }
  0x85   : > { %735 = vmatpush1.msra.mxu1 %v416_v26  ;;  %588 = vmatprep.subr.mxu0 %v527_v35  ;;  %v491_v9 = vld [vmem:[#allocation6 + $0x2a8] sm:$0xff]  ;;  %v497_v10 = vld [vmem:[#allocation6 + $0x2d8] sm:$0xff]  ;;  %v490_v11 = vld [vmem:[#allocation6 + $0x2a0] sm:$0xff] }
  0x86   : > { %736 = vmatprep.subr.mxu1 %v413_v28  ;;  %589 = vmatpush2.msra.mxu0 %v526_v38  ;;  %v496_v12 = vld [vmem:[#allocation6 + $0x2d0] sm:$0xff]  ;;  %v487_v13 = vld [vmem:[#allocation6 + $0x288] sm:$0xff]  ;;  %v493_v14 = vld [vmem:[#allocation6 + $0x2b8] sm:$0xff] }
  0x87   : > { %737 = vmatpush1.msra.mxu1 %v412_v30  ;;  %590 = vmatprep.subr.mxu0 %v523_v40  ;;  %v486_v15 = vld [vmem:[#allocation6 + $0x280] sm:$0xff]  ;;  %v492_v16 = vld [vmem:[#allocation6 + $0x2b0] sm:$0xff]  ;;  %v483_v17 = vld [vmem:[#allocation6 + $0x268] sm:$0xff] }
  0x88   : > { %738 = vmatprep.subr.mxu1 %v409_v32  ;;  %591 = vmatpush2.msra.mxu0 %v522_v42  ;;  %v489_v18 = vld [vmem:[#allocation6 + $0x298] sm:$0xff]  ;;  %v482_v19 = vld [vmem:[#allocation6 + $0x260] sm:$0xff]  ;;  %v488_v20 = vld [vmem:[#allocation6 + $0x290] sm:$0xff] }
  0x89   : > { %739 = vmatpush1.msra.mxu1 %v408_v34  ;;  %592 = vmatprep.subr.mxu0 %v519_v44  ;;  %v479_v21 = vld [vmem:[#allocation6 + $0x248] sm:$0xff]  ;;  %v485_v22 = vld [vmem:[#allocation6 + $0x278] sm:$0xff]  ;;  %v478_v23 = vld [vmem:[#allocation6 + $0x240] sm:$0xff] }
  0x8a   : > { %740 = vmatprep.subr.mxu1 %v533_v37  ;;  %593 = vmatpush2.msra.mxu0 %v518_v46  ;;  %v484_v24 = vld [vmem:[#allocation6 + $0x270] sm:$0xff]  ;;  %v475_v25 = vld [vmem:[#allocation6 + $0x228] sm:$0xff]  ;;  %v481_v26 = vld [vmem:[#allocation6 + $0x258] sm:$0xff] }
  0x8b   : > { %741 = vmatpush2.msra.mxu1 %v532_v39  ;;  %594 = vmatprep.subr.mxu0 %v515_v48  ;;  %v480_v27 = vld [vmem:[#allocation6 + $0x250] sm:$0xff]  ;;  %v474_v28 = vld [vmem:[#allocation6 + $0x220] sm:$0xff]  ;;  %v477_v30 = vld [vmem:[#allocation6 + $0x238] sm:$0xff] }
  0x8c   : > { %742 = vmatprep.subr.mxu1 %v529_v41  ;;  %595 = vmatpush2.msra.mxu0 %v514_v51  ;;  %v1828_v29 = vld [vmem:[#allocation2 + $0x22] ss:$8 sps:$4 sm:$0xff]   ;;  %v471_v31 = vld [vmem:[#allocation6 + $0x208] sm:$0xff]  ;;  %v470_v33 = vld [vmem:[#allocation6 + $0x200] sm:$0xff] }
  0x8d   : > { %743 = vmatpush2.msra.mxu1 %v528_v43  ;;  %596 = vmatprep.subr.mxu0 %v511_v53  ;;  %v476_v32 = vld [vmem:[#allocation6 + $0x230] sm:$0xff]  ;;  %v473_v34 = vld [vmem:[#allocation6 + $0x218] sm:$0xff]  ;;  %v1487_v53 = vld [vmem:[#allocation2 + $0x10] ss:$8 sps:$4 sm:$0xff]  }
  0x8e   : > { %744 = vmatprep.subr.mxu1 %v525_v45  ;;  %597 = vmatpush2.msra.mxu0 %v510_v55  ;;  %v472_v35 = vld [vmem:[#allocation6 + $0x210] sm:$0xff]  ;;  %v549_v37 = vld [vmem:[#allocation6 + $0x478] sm:$0xff] }
  0x8f   : > { %745 = vmatpush2.msra.mxu1 %v524_v47  ;;  %598 = vmatprep.subr.mxu0 %v507_v57  ;;  %v1484_v42 = vld [vmem:[#allocation2 + $0x9] ss:$8 sps:$4 sm:$0xff]  }
  0x90   : > { %746 = vmatprep.subr.mxu1 %v521_v49  ;;  %599 = vmatpush2.msra.mxu0 %v506_v59  ;;  %v1485_v43 = vld [vmem:[#allocation2] ss:$8 sps:$4 sm:$0xff]  }
  0x91   : > { %747 = vmatpush2.msra.mxu1 %v520_v50  ;;  %600 = vmatprep.subr.mxu0 %v503_v61  ;;  %v548_v61 = vld [vmem:[#allocation6 + $0x470] sm:$0xff] }
  0x92   : > { %748 = vmatprep.subr.mxu1 %v517_v52  ;;  %601 = vmatpush2.msra.mxu0 %v502_v63  ;;  %v1486_v52 = vld [vmem:[#allocation2 + $0x19] ss:$8 sps:$4 sm:$0xff]  }
  0x93   : > { %749 = vmatpush2.msra.mxu1 %v516_v54  ;;  %602 = vmatprep.subr.mxu0 %v499_v2 }
  0x94   : > { %750 = vmatprep.subr.mxu1 %v513_v56  ;;  %603 = vmatpush2.msra.mxu0 %v498_v4 }
  0x95   : > { %751 = vmatpush2.msra.mxu1 %v512_v58  ;;  %604 = vmatprep.subr.mxu0 %v495_v5 }
  0x96   : > { %752 = vmatprep.subr.mxu1 %v509_v60  ;;  %605 = vmatpush2.msra.mxu0 %v494_v7 }
  0x97   : > { %753 = vmatpush2.msra.mxu1 %v508_v62  ;;  %606 = vmatprep.subr.mxu0 %v491_v9 }
  0x98   : > { %754 = vmatprep.subr.mxu1 %v505_v1  ;;  %607 = vmatpush2.msra.mxu0 %v490_v11  ;;  %v545_v1 = vld [vmem:[#allocation6 + $0x458] sm:$0xff] }
  0x99   : > { %755 = vmatpush2.msra.mxu1 %v504_v3  ;;  %608 = vmatprep.subr.mxu0 %v487_v13  ;;  %v544_v3 = vld [vmem:[#allocation6 + $0x450] sm:$0xff] }
  0x9a   : > { %756 = vmatprep.subr.mxu1 %v501_v6  ;;  %609 = vmatpush2.msra.mxu0 %v486_v15  ;;  %v540_v13 = vld [vmem:[#allocation6 + $0x430] sm:$0xff] }
  0x9b   : > { %757 = vmatpush2.msra.mxu1 %v500_v8  ;;  %610 = vmatprep.subr.mxu0 %v483_v17  ;;  %v536_v15 = vld [vmem:[#allocation6 + $0x410] sm:$0xff] }
  0x9c   : > { %758 = vmatprep.subr.mxu1 %v497_v10  ;;  %611 = vmatpush2.msra.mxu0 %v482_v19  ;;  %v541_v10 = vld [vmem:[#allocation6 + $0x438] sm:$0xff] }
  0x9d   : > { %759 = vmatpush2.msra.mxu1 %v496_v12  ;;  %612 = vmatprep.subr.mxu0 %v479_v21 }
  0x9e   : > { %760 = vmatprep.subr.mxu1 %v493_v14  ;;  %613 = vmatpush2.msra.mxu0 %v478_v23  ;;  %v537_v14 = vld [vmem:[#allocation6 + $0x418] sm:$0xff] }
  0x9f   : > { %761 = vmatpush2.msra.mxu1 %v492_v16  ;;  %614 = vmatprep.subr.mxu0 %v475_v25 }
  0xa0   : > { %762 = vmatprep.subr.mxu1 %v489_v18  ;;  %701 = vmatprep.mubr.f32.mxu1 %v1645_v0  ;;  %v864_v18 = vlaneseq }
  0xa1   : > { %763 = vmatpush2.msra.mxu1 %v488_v20  ;;  %615 = vmatpush2.msra.mxu0 %v474_v28 }
  0xa2   : > { %764 = vmatprep.subr.mxu1 %v485_v22  ;;  %1344 = vmatmul.mubr.msk.f32.gmra.mxu1 %vm391_vm2, %v1828_v29  ;;  %v1851_v20 = vshrl.u32 %v864_v18, 7 }
  0xa3   : > { %765 = vmatpush2.msra.mxu1 %v484_v24  ;;  %616 = vmatprep.subr.mxu0 %v471_v31 }
  0xa4   : > { %766 = vmatprep.subr.mxu1 %v481_v26  ;;  %617 = vmatpush2.msra.mxu0 %v470_v33  ;;  %v870_v23 = vsub.s32 1, %v1851_v20  ;;  %v866_v24 = vsub.s32 0, %v1851_v20  ;;  %v862_v26 = vld [vmem:[#allocation8] sm:$0xf]  ;;  %v874_v28 = vsub.s32 2, %v1851_v20  ;;  %v878_v33 = vsub.s32 3, %v1851_v20 }
  0xa5   : > { %767 = vmatpush2.msra.mxu1 %v480_v27  ;;  %809 = vmatprep.subr.mxu0 %v549_v37 }
  0xa6   : > { %768 = vmatprep.subr.mxu1 %v477_v30  ;;  %v867_v31 = vrot.slane %v862_v26, %v866_v24 }
  0xa7   : > { %769 = vmatpush2.msra.mxu1 %v476_v32  ;;  %v892_v32 = vld [vmem:[%s1914_s3] sm:$0xf] }
  0xa8   : > { %770 = vmatprep.subr.mxu1 %v473_v34  ;;  %v901_v37 = vrot.slane %v892_v32, %v870_v23 }
  0xa9   : > { %771 = vmatpush2.msra.mxu1 %v472_v35 }
  0xd8   : > { %v1442_v38 = vpop.permute.xlu0 %1441 }
  0xd9   : > { %v1444_v39 = vunpack.i.h.bf16 %v1442_v38  ;;  %v1443_v40 = vunpack.i.l.bf16 %v1442_v38 }
  0xda   : > { %v1452_v41 = vpop.permute.xlu1 %1451 }
  0xdb   : > { %v1454_v47 = vunpack.i.h.bf16 %v1452_v41  ;;  %v1453_v48 = vunpack.i.l.bf16 %v1452_v41  ;;  %v400_v50 = vsel %vm391_vm2, %v1484_v42, %v1443_v40  ;;  %v392_v51 = vsel %vm391_vm2, %v1485_v43, %v1444_v39 }
  0xdc   : > { %v1447_v44 = vpop.permute.xlu0 %1446  ;;  %v875_v40 = vrot.slane %v862_v26, %v874_v28  ;;  %v897_v41 = vrot.slane %v892_v32, %v866_v24  ;;  %v1649_v42 = vmov 1983009808  }
  0xdd   : > { %v1449_v45 = vunpack.i.h.bf16 %v1447_v44  ;;  %v1448_v46 = vunpack.i.l.bf16 %v1447_v44  ;;  %v943_v43 = vunpack.c.l.s4 %v1649_v42 }
  0xde   : > { %v1457_v49 = vpop.permute.xlu1 %1456 }
  0xdf   : > { %v1459_v54 = vunpack.i.h.bf16 %v1457_v49  ;;  %v1458_v55 = vunpack.i.l.bf16 %v1457_v49  ;;  %v402_v56 = vsel %vm394_vm3, %v400_v50, %v1448_v46  ;;  %v395_v57 = vsel %vm394_vm3, %v392_v51, %v1449_v45 }
  0xe0   : > { %v1462_v58 = vpop.permute.xlu0 %1461  ;;  %v404_v59 = vsel %vm397_vm4, %v402_v56, %v1453_v48  ;;  %v398_v60 = vsel %vm397_vm4, %v395_v57, %v1454_v47  ;;  %v905_v48 = vrot.slane %v892_v32, %v874_v28  ;;  %v879_v49 = vrot.slane %v862_v26, %v878_v33 }
  0xe1   : > { %v1464_v62 = vunpack.i.h.bf16 %v1462_v58  ;;  %v1463_v63 = vunpack.i.l.bf16 %v1462_v58  ;;  %618 = vmatprep.mubr.f32.mxu0 %v404_v59  ;;  %772 = vmatprep.mubr.f32.mxu1 %v404_v59  ;;  %v401_v4 = vsel %vm391_vm2, %v1486_v52, %v1458_v55  ;;  %v393_v5 = vsel %vm391_vm2, %v1487_v53, %v1459_v54 }
  0xe2   : > { %v1467_v2 = vpop.permute.xlu1 %1466  ;;  %619 = vmatmul.mubr.f32.vlgmr.msra.gmra.mxu0 %v398_v60  ;;  %773 = vmatmul.mubr.f32.vlgmr.msra.gmra.mxu1 %v398_v60  ;;  %v909_v56 = vrot.slane %v892_v32, %v878_v33  ;;  %v944_v57 = vunpack.c.0.s8 %v943_v43 }
  0xe3   : > { %v1469_v6 = vunpack.i.h.bf16 %v1467_v2  ;;  %v1468_v7 = vunpack.i.l.bf16 %v1467_v2  ;;  %810 = vmatpush1.msra.mxu0 %v548_v61  ;;  %v403_v8 = vsel %vm394_vm3, %v401_v4, %v1463_v63  ;;  %v396_v9 = vsel %vm394_vm3, %v393_v5, %v1464_v62 }
  0xe4   : > { %811 = vmatprep.subr.mxu0 %v545_v1 }
  0xe5   : > { %812 = vmatpush1.msra.mxu0 %v544_v3  ;;  %v405_v11 = vsel %vm397_vm4, %v403_v8, %v1468_v7  ;;  %v399_v12 = vsel %vm397_vm4, %v396_v9, %v1469_v6  ;;  %v947_v6 = vsub.s32 %v944_v57, %v1851_v20 }
  0xe6   : > { %624 = vmatprep.mubr.f32.mxu0 %v405_v11  ;;  %778 = vmatprep.mubr.f32.mxu1 %v405_v11 }
  0xe7   : > { %813 = vmatprep.subr.mxu0 %v541_v10  ;;  %625 = vmatmul.mubr.f32.gmra.mxu0 %v399_v12 }
  0xe8   : > { %779 = vmatmul.mubr.f32.gmra.mxu1 %v399_v12  ;;  %814 = vmatpush1.msra.mxu0 %v540_v13  ;;  %v1650_v13 = vmov 1966171168  }
  0xe9   : > { %815 = vmatprep.subr.mxu0 %v537_v14  ;;  %849 = vmatprep.mubr.f32.mxu0 %v1645_v0  ;;  %v1019_v14 = vunpack.c.l.s4 %v1650_v13 }
  0xea   : > { %816 = vmatpush1.msra.mxu0 %v536_v15 }
  0xeb   : > { %1345 = vmatmul.mubr.msk.f32.vlgmr.msra.gmra.mxu0 %vm391_vm2, %v1824_v36 }
  0xec   : > { %855 = vmatprep.mubr.f32.mxu0 %v1645_v0  ;;  %v871_v0 = vrot.slane %v862_v26, %v870_v23 }
  0xef   : > { %1346 = vmatmul.mubr.msk.f32.gmra.mxu0 %vm391_vm2, %v1828_v29 }
 0x12a   : > { %v697_v16 = vpop.f32.mrf.mxu1 }
 0x12c   : > { %v699_v17 = vpop.f32.mrf.mxu1 }
 0x162   : > { %v703_v19 = vpop.f32.mrf.mxu1 }
 0x164   : > { %v705_v21 = vpop.f32.mrf.mxu1 }
 0x1a2   : > { %v620_v22 = vpop.f32.mrf.mxu0  ;;  %v774_v36 = vpop.f32.mrf.mxu1 }
 0x1a3   : > { %v698_v30 = vadd.f32 %v697_v16, %v620_v22 }
 0x1a4   : > { %v622_v25 = vpop.f32.mrf.mxu0  ;;  %v776_v38 = vpop.f32.mrf.mxu1 }
 0x1a5   : > { %v700_v27 = vadd.f32 %v699_v17, %v622_v25  ;;  %v884_v46 = vmul.f32 %v867_v31, %v698_v30 }
 0x1a7   : > { %v626_v29 = vpop.f32.mrf.mxu0  ;;  %v885_v35 = vmul.f32 %v871_v0, %v700_v27  ;;  %v914_v60 = vadd.f32 %v897_v41, %v884_v46  ;;  %v1651_v27 = vmov 1935823168  }
 0x1a8   : > { %v704_v44 = vadd.f32 %v703_v19, %v626_v29  ;;  %v780_v53 = vpop.f32.mrf.mxu1 }
 0x1a9   : > { %v628_v34 = vpop.f32.mrf.mxu0  ;;  %v915_v52 = vadd.f32 %v901_v37, %v885_v35  ;;  %v922_v10 = vmax.f32 %v914_v60, 0.0 }
 0x1aa   : > { %v706_v39 = vadd.f32 %v705_v21, %v628_v34  ;;  %v888_v58 = vmul.f32 %v867_v31, %v704_v44  ;;  %v782_v4 = vpop.f32.mrf.mxu1 }
 0x1ab   : > { %v851_v45 = vpop.f32.mrf.mxu0  ;;  %v923_v3 = vmax.f32 %v915_v52, 0.0 }
 0x1ac   : > { %v852_v47 = vadd.f32 %v851_v45, %v774_v36  ;;  %v889_v50 = vmul.f32 %v871_v0, %v706_v39  ;;  %v918_v7 = vadd.f32 %v897_v41, %v888_v58  ;;  %v1020_v36 = vunpack.c.0.s8 %v1019_v14 }
 0x1ad   : > { %v853_v51 = vpop.f32.mrf.mxu0  ;;  %v938_v18 = vcombine.low %v922_v10, %v923_v3  ;;  %v939_v19 = vcombine.high %v922_v10, %v923_v3  ;;  %v1087_v0 = vunpack.c.l.s4 %v1651_v27 }
 0x1ae   : > { %v886_v54 = vmul.f32 %v875_v40, %v852_v47  ;;  %v854_v55 = vadd.f32 %v853_v51, %v776_v38  ;;  %v919_v1 = vadd.f32 %v901_v37, %v889_v50  ;;  %v926_v23 = vmax.f32 %v918_v7, 0.0 }
 0x1af   : > { %v857_v59 = vpop.f32.mrf.mxu0  ;;  %v948_v32 = vrot.slane %v938_v18, %v947_v6  ;;  %v955_v33 = vrot.slane %v939_v19, %v947_v6  ;;  %v1023_v39 = vsub.s32 %v1020_v36, %v1851_v20 }
 0x1b0   : > { %v916_v61 = vadd.f32 %v905_v48, %v886_v54  ;;  %v887_v62 = vmul.f32 %v879_v49, %v854_v55  ;;  %v858_v63 = vadd.f32 %v857_v59, %v780_v53  ;;  %v927_v15 = vmax.f32 %v919_v1, 0.0 }
 0x1b1   : > { %v859_v2 = vpop.f32.mrf.mxu0 }
 0x1b2   : > { %v917_v5 = vadd.f32 %v909_v56, %v887_v62  ;;  %v890_v8 = vmul.f32 %v875_v40, %v858_v63  ;;  %v860_v9 = vadd.f32 %v859_v2, %v782_v4  ;;  %v924_v11 = vmax.f32 %v916_v61, 0.0 }
 0x1b3   : > { %v974_v28 = vcombine.low %v926_v23, %v927_v15  ;;  %v975_v29 = vcombine.high %v926_v23, %v927_v15  ;;  %v1088_v40 = vunpack.c.0.s8 %v1087_v0 }
 0x1b4   : > { %v925_v12 = vmax.f32 %v917_v5, 0.0  ;;  %v920_v16 = vadd.f32 %v905_v48, %v890_v8  ;;  %v891_v17 = vmul.f32 %v879_v49, %v860_v9 }
 0x1b5   : > { %v984_v41 = vrot.slane %v974_v28, %v947_v6  ;;  %v991_v42 = vrot.slane %v975_v29, %v947_v6  ;;  %v1091_v53 = vsub.s32 %v1088_v40, %v1851_v20 }
 0x1b6   : > { %v940_v21 = vcombine.low %v924_v11, %v925_v12  ;;  %v941_v22 = vcombine.high %v924_v11, %v925_v12  ;;  %v921_v24 = vadd.f32 %v909_v56, %v891_v17  ;;  %v928_v30 = vmax.f32 %v920_v16, 0.0 }
 0x1b8   : > { %v962_v25 = vrot.slane %v940_v21, %v947_v6  ;;  %v969_v26 = vrot.slane %v941_v22, %v947_v6  ;;  %v929_v31 = vmax.f32 %v921_v24, 0.0 }
 0x1ba   : > { %v976_v34 = vcombine.low %v928_v30, %v929_v31  ;;  %v977_v35 = vcombine.high %v928_v30, %v929_v31  ;;  %v970_v37 = vcombine.low %v948_v32, %v962_v25  ;;  %v972_v38 = vcombine.low %v955_v33, %v969_v26 }
 0x1bb   : > { %v971_v45 = vcombine.high %v948_v32, %v962_v25  ;;  %v973_v46 = vcombine.high %v955_v33, %v969_v26 }
 0x1bc   : > { %v998_v43 = vrot.slane %v976_v34, %v947_v6  ;;  %v1005_v44 = vrot.slane %v977_v35, %v947_v6  ;;  %v1024_v51 = vrot.slane %v970_v37, %v1023_v39  ;;  %v1038_v52 = vrot.slane %v972_v38, %v1023_v39 }
 0x1bd   : > { %v1031_v58 = vrot.slane %v971_v45, %v1023_v39  ;;  %v1045_v59 = vrot.slane %v973_v46, %v1023_v39 }
 0x1be   : > { %v1006_v47 = vcombine.low %v984_v41, %v998_v43  ;;  %v1007_v48 = vcombine.high %v984_v41, %v998_v43  ;;  %v1008_v49 = vcombine.low %v991_v42, %v1005_v44  ;;  %v1009_v50 = vcombine.high %v991_v42, %v1005_v44 }
 0x1c0   : > { %v1052_v54 = vrot.slane %v1006_v47, %v1023_v39  ;;  %v1059_v55 = vrot.slane %v1007_v48, %v1023_v39  ;;  %v1066_v56 = vrot.slane %v1008_v49, %v1023_v39  ;;  %v1073_v57 = vrot.slane %v1009_v50, %v1023_v39 }
 0x1c2   : > { %v1082_v60 = vcombine.low %v1024_v51, %v1052_v54  ;;  %v1083_v61 = vcombine.high %v1024_v51, %v1052_v54  ;;  %v1084_v62 = vcombine.low %v1038_v52, %v1066_v56  ;;  %v1085_v63 = vcombine.high %v1038_v52, %v1066_v56 }
 0x1c3   : > { %v1146_v1 = vcombine.low %v1031_v58, %v1059_v55  ;;  %v1147_v2 = vcombine.high %v1031_v58, %v1059_v55  ;;  %v1148_v3 = vcombine.low %v1045_v59, %v1073_v57  ;;  %v1149_v4 = vcombine.high %v1045_v59, %v1073_v57 }
 0x1c4   : > { %v1092_v5 = vrot.slane %v1082_v60, %v1091_v53  ;;  %v1099_v6 = vrot.slane %v1084_v62, %v1091_v53  ;;  %v1106_v7 = vrot.slane %v1083_v61, %v1091_v53  ;;  %v1113_v8 = vrot.slane %v1085_v63, %v1091_v53 }
 0x1c5   : > { %v1156_v20 = vrot.slane %v1146_v1, %v1091_v53  ;;  %v1163_v9 = vrot.slane %v1148_v3, %v1091_v53  ;;  %v1170_v10 = vrot.slane %v1147_v2, %v1091_v53  ;;  %v1177_v11 = vrot.slane %v1149_v4, %v1091_v53 }
 0x1c6   : > { %v1114_v12 = vcombine.low %v1092_v5, %v1099_v6  ;;  %v1115_v13 = vcombine.high %v1092_v5, %v1099_v6  ;;  %v1116_v14 = vcombine.low %v1106_v7, %v1113_v8  ;;  %v1117_v15 = vcombine.high %v1106_v7, %v1113_v8 }
 0x1c7   : > { %v1178_v16 = vcombine.low %v1156_v20, %v1163_v9  ;;  %v1179_v17 = vcombine.high %v1156_v20, %v1163_v9  ;;  %v1180_v18 = vcombine.low %v1170_v10, %v1177_v11  ;;  %v1181_v19 = vcombine.high %v1170_v10, %v1177_v11 }
 0x1c8   : > { %1347 = vst.sshfl [vmem:[%s242_s24] sm:$0xff pattern:$0x75316420] %v1114_v12  ;;  %1348 = vst.sshfl [vmem:[%s242_s24 + $0x8] sm:$0xff pattern:$0x75316420] %v1115_v13 }
 0x1c9   : > { %1349 = vst.sshfl [vmem:[%s242_s24 + $0x10] sm:$0xff pattern:$0x75316420] %v1116_v14  ;;  %1350 = vst.sshfl [vmem:[%s242_s24 + $0x18] sm:$0xff pattern:$0x75316420] %v1117_v15 }
 0x1ca   : > { %1351 = vst.sshfl [vmem:[%s242_s24 + $0x20] sm:$0xff pattern:$0x75316420] %v1178_v16  ;;  %1352 = vst.sshfl [vmem:[%s242_s24 + $0x28] sm:$0xff pattern:$0x75316420] %v1179_v17 }
 0x1cb   : > { %1353 = vst.sshfl [vmem:[%s242_s24 + $0x30] sm:$0xff pattern:$0x75316420] %v1180_v18  ;;  %1354 = vst.sshfl [vmem:[%s242_s24 + $0x38] sm:$0xff pattern:$0x75316420] %v1181_v19 }
 0x1cc   : > { %1581 = shalt.err (!%p1578_p9)
}
 0x1cd   : > { %s1582_s21 = scalar_lea.hbm %s1868_s19, 1024  ;;  %s1586_s29 = scalar_lea.hbm %s1915_s4, 2048 }
 0x1ce   : > { %p1583_p13 = scmp.ne.s32.totalorder %s1868_s19, %s1582_s21  ;;  %p1587_p4 = scmp.lt.s32.totalorder %s1868_s19, %s1915_s4 }
 0x1cf   : > { %p1588_p8 = scmp.lt.s32.totalorder %s1586_s29, %s1582_s21 }
 0x1d0   : > { %p1584_p5 = pnand %p1583_p13, %p1931_p10 }
 0x1d1   : > { %p1589_p3 = por %p1588_p8, %p1587_p4 }
 0x1d2   : > { %p1585_p0 = pneg %p1584_p5 }
 0x1d4   : > { %p1590_p11 = pnand %p1589_p3, %p1585_p0 }
 0x1d6   : > { %1593 = shalt.err (!%p1590_p11)
}
 0x1d7   : > { %1372 = dma.vmem_to_hbm [thread:$0]  (%p1931_p10), %s1870_s26, 1024, %s1868_s19, %s1227_s30  }
 0x1d8 PF: > { %s1253_s7 = sand.u32 1, %s1624_s15   ;;  %p1932_p1 = scmp.ne.s32.totalorder %s1921_s22, 0 }
 0x1d9   : > { %p1933_p2 = scmp.ge.s32.totalorder %s1636_s18, 2  ;;  %s1254_s25 = scalar_lea.sflag [#allocation5], %s1253_s7 }
 0x1db   : > { %p1386_p6 = pnand %p1933_p2, %p1932_p1 }
 0x1dd   : > { %p1387_p12 = pneg %p1386_p6 }
 0x1df   : > { %1619 = dma.done.wait (%p1387_p12), %s1254_s25, 1024  }
 0x1e0   : > { %1621 = vsyncadd (%p1387_p12), %s1254_s25, 4294966272  ;;  %p18_p7 = scmp.ge.s32.totalorder %s1750_s11, 4   ;;  %s1934_s15 = smov %s1628_s16 }
 0x1e1   : > { %s1935_s16 = smov %s1632_s17  ;;  %s1936_s17 = smov %s1766_s20 }
 0x1e2   : > { %s1937_s18 = smov %s1750_s11  ;;  %20 = sbr.rel (!%p18_p7) target bundleno = 6 (0x6), region = 91 }
 0x1e7   :  { %1259 = vsyncpa [#allocation4], 1 }
 0x1e8   :  { %1261 = vsyncpa [#allocation4 + $0x1], 1 }
 0x1e9   :  { %1262 = vsyncpa [#allocation7], 1 }
 0x1ea   :  { %1263 = vsyncpa [#allocation5], 1 }
 0x1eb   :  { %1265 = vsyncpa [#allocation5 + $0x1], 1 }

</bundles_post_ra>
